<compile_context>
chip_gen: v5e
topology: v5e:2x2
jax: 0.10.0
libtpu: 0.0.40
codegen_flags: <defaults>
</compile_context>

<pallas_src>
import jax
import jax.numpy as jnp
from jax.experimental import pallas as pl
from jax.experimental.pallas import tpu as pltpu


# ---------------------------------------------------------------------------
# Fused layer kernel:
#   incoming-BN affine -> (adj+I)@x -> flattened projection -> bias -> ReLU
#   -> store activations + partial BN statistics for this batch tile.
# ---------------------------------------------------------------------------
def _gconv_layer_kernel(adj_ref, x_ref, w_ref, b_ref, sc_ref, sh_ref,
                        h_ref, sum_ref, sq_ref):
    bb, n, cin = x_ref.shape
    cout = w_ref.shape[1]

    # Previous layer's BatchNorm folded in as an affine transform (f32 VPU work);
    # identity (scale=1, shift=0) for the first layer.
    sc = sc_ref[...].reshape(1, 1, cin)
    sh = sh_ref[...].reshape(1, 1, cin)
    xn = (x_ref[...] * sc + sh).astype(jnp.bfloat16)          # (bb, n, cin)

    # Neighbourhood aggregation with the self loop already folded into adj.
    agg = jnp.einsum("bij,bjc->bic", adj_ref[...], xn,
                     preferred_element_type=jnp.float32)      # (bb, n, cin) f32

    # One flattened projection matmul: M = bb*n fills the MXU instead of M = n.
    flat = agg.reshape(bb * n, cin).astype(jnp.bfloat16)
    y = jnp.dot(flat, w_ref[...], preferred_element_type=jnp.float32)
    h = jnp.maximum(y + b_ref[...], 0.0)                      # bias + ReLU, f32

    h_ref[...] = h.reshape(bb, n, cout)

    # Partial BatchNorm statistics for this batch tile (fused reduction saves a
    # full HBM round trip over the activations per layer).
    sum_ref[0] = jnp.sum(h, axis=0, keepdims=True)            # (1, cout)
    sq_ref[0] = jnp.sum(h * h, axis=0, keepdims=True)         # (1, cout)


def _pick_batch_tile(B, N, cin, cout):
    # Keep the per-step working set (bf16 adj block + f32 in/out activation
    # blocks) around a few MiB so double-buffered blocks stay far below the
    # 64 MiB physical VMEM of v7x (and the 32 MiB default scoped limit).
    bytes_per_b = 2 * N * N + 4 * N * (cin + cout) + 2 * N * cin
    budget = 4 * 1024 * 1024
    bb = max(1, min(B, budget // max(bytes_per_b, 1)))
    while B % bb:  # keep the grid exact
        bb -= 1
    return bb


def graph_conv_layer(adj_hat16, x, w, b, in_scale, in_shift, *, batch_tile=None):
    """Returns (relu activations (B,N,Cout) f32, channel sum (1,Cout), channel sumsq (1,Cout))."""
    B, N, Cin = x.shape
    Cout = w.shape[1]
    bb = batch_tile or _pick_batch_tile(B, N, Cin, Cout)
    G = B // bb

    w16 = w.astype(jnp.bfloat16)
    b2 = b.reshape(1, Cout)

    h, psum, psq = pl.pallas_call(
        _gconv_layer_kernel,
        out_shape=(
            jax.ShapeDtypeStruct((B, N, Cout), jnp.float32),
            jax.ShapeDtypeStruct((G, 1, Cout), jnp.float32),
            jax.ShapeDtypeStruct((G, 1, Cout), jnp.float32),
        ),
        grid=(G,),
        in_specs=[
            pl.BlockSpec((bb, N, N), lambda g: (g, 0, 0)),     # adj (+I), bf16
            pl.BlockSpec((bb, N, Cin), lambda g: (g, 0, 0)),   # activations, f32
            pl.BlockSpec((Cin, Cout), lambda g: (0, 0)),       # weight (constant index -> kept resident)
            pl.BlockSpec((1, Cout), lambda g: (0, 0)),         # bias
            pl.BlockSpec((1, Cin), lambda g: (0, 0)),          # folded BN scale
            pl.BlockSpec((1, Cin), lambda g: (0, 0)),          # folded BN shift
        ],
        out_specs=(
            pl.BlockSpec((bb, N, Cout), lambda g: (g, 0, 0)),
            pl.BlockSpec((1, 1, Cout), lambda g: (g, 0, 0)),
            pl.BlockSpec((1, 1, Cout), lambda g: (g, 0, 0)),
        ),
        compiler_params=pltpu.CompilerParams(
            dimension_semantics=("parallel",),                 # megacore / 2-TC friendly
            vmem_limit_bytes=64 * 1024 * 1024,
        ),
    )(adj_hat16, x, w16, b2, in_scale, in_shift)

    # Tiny cross-tile reduction of the partial stats (G x Cout values) in XLA.
    return h, jnp.sum(psum, axis=0), jnp.sum(psq, axis=0)


# ---------------------------------------------------------------------------
# Final BatchNorm apply (last layer only): lane-dense elementwise affine.
# ---------------------------------------------------------------------------
def _affine_kernel(x_ref, sc_ref, sh_ref, o_ref):
    o_ref[...] = x_ref[...] * sc_ref[...] + sh_ref[...]


def _pick_row_tile(rows):
    for cand in (2048, 1024, 512, 256, 128, 64, 32, 16, 8):
        if cand <= rows and rows % cand == 0:
            return cand
    return rows


def batchnorm_apply(h, scale, shift):
    """out = h * scale + shift, per channel (scale/shift shaped (1, C))."""
    B, N, C = h.shape
    total = B * N * C
    if total % 128 == 0 and 128 % C == 0:
        # Lane-dense path: view the slab as (rows, 128) and tile scale/shift
        # along the lane axis so every store is a full-width (unmasked) vst.
        reps = 128 // C
        rows = total // 128
        x2 = h.reshape(rows, 128)
        sc2 = jnp.tile(scale.reshape(1, C), (1, reps))
        sh2 = jnp.tile(shift.reshape(1, C), (1, reps))
        rt = _pick_row_tile(rows)
        out = pl.pallas_call(
            _affine_kernel,
            out_shape=jax.ShapeDtypeStruct((rows, 128), jnp.float32),
            grid=(rows // rt,),
            in_specs=[
                pl.BlockSpec((rt, 128), lambda i: (i, 0)),
                pl.BlockSpec((1, 128), lambda i: (0, 0)),
                pl.BlockSpec((1, 128), lambda i: (0, 0)),
            ],
            out_specs=pl.BlockSpec((rt, 128), lambda i: (i, 0)),
            compiler_params=pltpu.CompilerParams(
                dimension_semantics=("parallel",)),
        )(x2, sc2, sh2)
        return out.reshape(B, N, C)

    # Fallback (C does not divide 128): row-tiled (B*N, C) apply.
    x2 = h.reshape(B * N, C)
    rt = _pick_row_tile(B * N)
    out = pl.pallas_call(
        _affine_kernel,
        out_shape=jax.ShapeDtypeStruct((B * N, C), jnp.float32),
        grid=((B * N) // rt,),
        in_specs=[
            pl.BlockSpec((rt, C), lambda i: (i, 0)),
            pl.BlockSpec((1, C), lambda i: (0, 0)),
            pl.BlockSpec((1, C), lambda i: (0, 0)),
        ],
        out_specs=pl.BlockSpec((rt, C), lambda i: (i, 0)),
        compiler_params=pltpu.CompilerParams(
            dimension_semantics=("parallel",)),
    )(x2, scale, shift)
    return out.reshape(B, N, C)


# ---------------------------------------------------------------------------
# GCN forward: num_gc_layers stacked (GraphConv -> ReLU -> BN).
# BN of layer i is folded into layer i+1's kernel as (scale, shift); only the
# last layer's BN runs as a standalone lane-dense apply pass.
# ---------------------------------------------------------------------------
def gcn_forward(x, adj, params):
    B, N, in_dim = x.shape
    count = B * N
    # Fold the self loop once, cast to bf16 (halves HBM traffic on the B*N*N term).
    adj_hat16 = (adj + jnp.eye(N, dtype=adj.dtype)[None]).astype(jnp.bfloat16)

    scale = jnp.ones((1, in_dim), jnp.float32)   # identity affine for layer 0
    shift = jnp.zeros((1, in_dim), jnp.float32)
    h = x
    for (w, b, gamma, beta) in params:
        h, ssum, ssq = graph_conv_layer(adj_hat16, h, w, b, scale, shift)
        mean = ssum / count                              # (1, Cout)
        var = ssq / count - mean * mean                  # biased batch variance
        inv = jax.lax.rsqrt(var + 1e-5)
        scale = gamma.reshape(1, -1) * inv
        shift = beta.reshape(1, -1) - mean * scale
    return batchnorm_apply(h, scale, shift)


def init_gcn_params(key, in_dim, hid_dim, out_dim, num_gc_layers=2):
    if num_gc_layers == 1:
        dims = [(in_dim, out_dim)]
    else:
        dims = [(in_dim, hid_dim)]
        dims += [(hid_dim, hid_dim)] * (num_gc_layers - 2)
        dims += [(hid_dim, out_dim)]
    params = []
    for (cin, cout) in dims:
        key, kw = jax.random.split(key)
        w = jax.random.normal(kw, (cin, cout), jnp.float32) * 0.1
        b = jnp.zeros((cout,), jnp.float32)
        gamma = jnp.ones((cout,), jnp.float32)   # PyTorch BN default init
        beta = jnp.zeros((cout,), jnp.float32)
        params.append((w, b, gamma, beta))
    return params


# ---------------------------------------------------------------------------
# Pure-JAX reference implementing the same math (bf16 matmul inputs with f32
# accumulation, BN applied in scale/shift form) for a tight sanity check.
# ---------------------------------------------------------------------------
def gcn_reference(x, adj, params):
    B, N, in_dim = x.shape
    count = B * N
    adj_hat16 = (adj + jnp.eye(N, dtype=adj.dtype)[None]).astype(jnp.bfloat16)
    scale = jnp.ones((1, in_dim), jnp.float32)
    shift = jnp.zeros((1, in_dim), jnp.float32)
    h = x
    for (w, b, gamma, beta) in params:
        xn = (h * scale + shift).astype(jnp.bfloat16)
        agg = jnp.einsum("bij,bjc->bic", adj_hat16, xn,
                         preferred_element_type=jnp.float32)
        y = jnp.einsum("bnc,cd->bnd", agg.astype(jnp.bfloat16),
                       w.astype(jnp.bfloat16),
                       preferred_element_type=jnp.float32) + b
        h = jnp.maximum(y, 0.0)
        mean = (jnp.sum(h, axis=(0, 1)) / count).reshape(1, -1)
        var = (jnp.sum(h * h, axis=(0, 1)) / count).reshape(1, -1) - mean * mean
        inv = jax.lax.rsqrt(var + 1e-5)
        scale = gamma.reshape(1, -1) * inv
        shift = beta.reshape(1, -1) - mean * scale
    return h * scale + shift


if __name__ == "__main__":
    B, N = 2, 16
    in_dim, hid_dim, out_dim = 8, 32, 16
    num_gc_layers = 2

    key = jax.random.PRNGKey(0)
    kx, ka, kp = jax.random.split(key, 3)

    x = jax.random.normal(kx, (B, N, in_dim), jnp.float32)
    # symmetric non-negative adjacency
    a_raw = jax.random.uniform(ka, (B, N, N), jnp.float32)
    adj = 0.5 * (a_raw + jnp.swapaxes(a_raw, 1, 2))

    params = init_gcn_params(kp, in_dim, hid_dim, out_dim, num_gc_layers)

    out = jax.block_until_ready(gcn_forward(x, adj, params))
    ref = gcn_reference(x, adj, params)

    assert out.shape == (B, N, out_dim)
    # bf16 matmul inputs => compare against the matched bf16 reference with a
    # modest tolerance (accumulation order differs between MXU and XLA paths).
    assert jnp.allclose(out, ref, atol=5e-3, rtol=5e-3), "mismatch vs reference"

    print("KERNEL_OK")
</pallas_src>

<mosaic_0001>
module attributes {stable_mosaic.version = 11 : i64} {
  func.func @_gconv_layer_kernel(%arg0: i32, %arg1: memref<2x16x16xbf16, #tpu.memory_space<vmem>>, %arg2: memref<2x16x8xf32, #tpu.memory_space<vmem>>, %arg3: memref<8x32xbf16, #tpu.memory_space<vmem>>, %arg4: memref<1x32xf32, #tpu.memory_space<vmem>>, %arg5: memref<1x8xf32, #tpu.memory_space<vmem>>, %arg6: memref<1x8xf32, #tpu.memory_space<vmem>>, %arg7: memref<2x16x32xf32, #tpu.memory_space<vmem>>, %arg8: memref<1x1x32xf32, #tpu.memory_space<vmem>>, %arg9: memref<1x1x32xf32, #tpu.memory_space<vmem>>) attributes {dimension_semantics = [#tpu.dimension_semantics<parallel>], iteration_bounds = array<i64: 1>, scalar_prefetch = 0 : i64, scratch_operands = 0 : i64, tpu.core_type = #tpu.core_type<tc>, window_params = [{transform_indices = @transform_0, window_bounds = array<i64: 2, 16, 16>}, {transform_indices = @transform_1, window_bounds = array<i64: 2, 16, 8>}, {pipeline_mode = #tpu.pipeline_mode<synchronous>, transform_indices = @transform_2, window_bounds = array<i64: 8, 32>}, {pipeline_mode = #tpu.pipeline_mode<synchronous>, transform_indices = @transform_3, window_bounds = array<i64: 1, 32>}, {pipeline_mode = #tpu.pipeline_mode<synchronous>, transform_indices = @transform_4, window_bounds = array<i64: 1, 8>}, {pipeline_mode = #tpu.pipeline_mode<synchronous>, transform_indices = @transform_5, window_bounds = array<i64: 1, 8>}, {transform_indices = @transform_6, window_bounds = array<i64: 2, 16, 32>}, {transform_indices = @transform_7, window_bounds = array<i64: 1, 1, 32>}, {transform_indices = @transform_8, window_bounds = array<i64: 1, 1, 32>}]} {
    %c0 = arith.constant 0 : index
    %c0_0 = arith.constant 0 : index
    %0 = vector.load %arg5[%c0, %c0_0] : memref<1x8xf32, #tpu.memory_space<vmem>>, vector<1x8xf32>
    %1 = vector.shape_cast %0 : vector<1x8xf32> to vector<1x1x8xf32>
    %c0_1 = arith.constant 0 : index
    %c0_2 = arith.constant 0 : index
    %2 = vector.load %arg6[%c0_1, %c0_2] : memref<1x8xf32, #tpu.memory_space<vmem>>, vector<1x8xf32>
    %3 = vector.shape_cast %2 : vector<1x8xf32> to vector<1x1x8xf32>
    %c0_3 = arith.constant 0 : index
    %c0_4 = arith.constant 0 : index
    %c0_5 = arith.constant 0 : index
    %4 = vector.load %arg2[%c0_3, %c0_4, %c0_5] : memref<2x16x8xf32, #tpu.memory_space<vmem>>, vector<2x16x8xf32>
    %5 = vector.broadcast %1 : vector<1x1x8xf32> to vector<2x16x8xf32>
    %6 = arith.mulf %4, %5 : vector<2x16x8xf32>
    %7 = vector.broadcast %3 : vector<1x1x8xf32> to vector<2x16x8xf32>
    %8 = arith.addf %6, %7 : vector<2x16x8xf32>
    %9 = arith.truncf %8 : vector<2x16x8xf32> to vector<2x16x8xbf16>
    %c0_6 = arith.constant 0 : index
    %c0_7 = arith.constant 0 : index
    %c0_8 = arith.constant 0 : index
    %10 = vector.load %arg1[%c0_6, %c0_7, %c0_8] : memref<2x16x16xbf16, #tpu.memory_space<vmem>>, vector<2x16x16xbf16>
    "tpu.trace_start"() <{level = 10 : i32, message = "bij,bjc->bic"}> : () -> ()
    %cst = arith.constant dense<0.000000e+00> : vector<2x16x8xf32>
    %11 = tpu.matmul %10, %9, %cst {dimension_numbers = #tpu.dot_dimension_numbers<[2], [1], [1], [2], [0, 0, 0, 1, 1, 2], [0], [0]>} : vector<2x16x16xbf16>, vector<2x16x8xbf16>, vector<2x16x8xf32> -> vector<2x16x8xf32>
    "tpu.trace_stop"() : () -> ()
    %12 = vector.shape_cast %11 : vector<2x16x8xf32> to vector<32x8xf32>
    %13 = arith.truncf %12 : vector<32x8xf32> to vector<32x8xbf16>
    %c0_9 = arith.constant 0 : index
    %c0_10 = arith.constant 0 : index
    %14 = vector.load %arg3[%c0_9, %c0_10] : memref<8x32xbf16, #tpu.memory_space<vmem>>, vector<8x32xbf16>
    %cst_11 = arith.constant dense<0.000000e+00> : vector<32x32xf32>
    %15 = tpu.matmul %13, %14, %cst_11 {dimension_numbers = #tpu.dot_dimension_numbers<[1], [0], [0], [1], [0, 0, 1, 1], [], []>} : vector<32x8xbf16>, vector<8x32xbf16>, vector<32x32xf32> -> vector<32x32xf32>
    %c0_12 = arith.constant 0 : index
    %c0_13 = arith.constant 0 : index
    %16 = vector.load %arg4[%c0_12, %c0_13] : memref<1x32xf32, #tpu.memory_space<vmem>>, vector<1x32xf32>
    %17 = vector.broadcast %16 : vector<1x32xf32> to vector<32x32xf32>
    %18 = arith.addf %15, %17 : vector<32x32xf32>
    %cst_14 = arith.constant 0.000000e+00 : f32
    %19 = vector.broadcast %cst_14 : f32 to vector<32x32xf32>
    %20 = arith.maximumf %18, %19 : vector<32x32xf32>
    %21 = vector.shape_cast %20 : vector<32x32xf32> to vector<2x16x32xf32>
    %c0_15 = arith.constant 0 : index
    %c0_16 = arith.constant 0 : index
    %c0_17 = arith.constant 0 : index
    %22 = vector.load %arg7[%c0_15, %c0_16, %c0_17] : memref<2x16x32xf32, #tpu.memory_space<vmem>>, vector<2x16x32xf32>
    tpu.vector_store %arg7[%c0_15, %c0_16, %c0_17], %21 {strides = array<i32>} : memref<2x16x32xf32, #tpu.memory_space<vmem>>, vector<2x16x32xf32>,
    %cst_18 = arith.constant dense<0.000000e+00> : vector<32xf32>
    %23 = vector.multi_reduction <add>, %20, %cst_18 [0] : vector<32x32xf32> to vector<32xf32>
    %24 = vector.shape_cast %23 : vector<32xf32> to vector<1x32xf32>
    %c0_19 = arith.constant 0 : index
    %c0_20 = arith.constant 0 : index
    %c0_21 = arith.constant 0 : index
    %25 = vector.load %arg8[%c0_19, %c0_20, %c0_21] : memref<1x1x32xf32, #tpu.memory_space<vmem>>, vector<1x1x32xf32>
    %26 = vector.shape_cast %25 : vector<1x1x32xf32> to vector<1x32xf32>
    %27 = vector.shape_cast %24 : vector<1x32xf32> to vector<1x1x32xf32>
    tpu.vector_store %arg8[%c0_19, %c0_20, %c0_21], %27 {strides = array<i32>} : memref<1x1x32xf32, #tpu.memory_space<vmem>>, vector<1x1x32xf32>,
    %28 = arith.mulf %20, %20 : vector<32x32xf32>
    %cst_22 = arith.constant dense<0.000000e+00> : vector<32xf32>
    %29 = vector.multi_reduction <add>, %28, %cst_22 [0] : vector<32x32xf32> to vector<32xf32>
    %30 = vector.shape_cast %29 : vector<32xf32> to vector<1x32xf32>
    %c0_23 = arith.constant 0 : index
    %c0_24 = arith.constant 0 : index
    %c0_25 = arith.constant 0 : index
    %31 = vector.load %arg9[%c0_23, %c0_24, %c0_25] : memref<1x1x32xf32, #tpu.memory_space<vmem>>, vector<1x1x32xf32>
    %32 = vector.shape_cast %31 : vector<1x1x32xf32> to vector<1x32xf32>
    %33 = vector.shape_cast %30 : vector<1x32xf32> to vector<1x1x32xf32>
    tpu.vector_store %arg9[%c0_23, %c0_24, %c0_25], %33 {strides = array<i32>} : memref<1x1x32xf32, #tpu.memory_space<vmem>>, vector<1x1x32xf32>,
    return
  }
  func.func @transform_0(%arg0: i32) -> (i32, i32, i32) {
    %c0_i32 = arith.constant 0 : i32
    %c0_i32_0 = arith.constant 0 : i32
    %c0_i32_1 = arith.constant 0 : i32
    return %arg0, %c0_i32, %c0_i32_0 : i32, i32, i32
  }
  func.func @transform_1(%arg0: i32) -> (i32, i32, i32) {
    %c0_i32 = arith.constant 0 : i32
    %c0_i32_0 = arith.constant 0 : i32
    %c0_i32_1 = arith.constant 0 : i32
    return %arg0, %c0_i32, %c0_i32_0 : i32, i32, i32
  }
  func.func @transform_2(%arg0: i32) -> (i32, i32) {
    %c0_i32 = arith.constant 0 : i32
    %c0_i32_0 = arith.constant 0 : i32
    %c0_i32_1 = arith.constant 0 : i32
    return %c0_i32, %c0_i32_0 : i32, i32
  }
  func.func @transform_3(%arg0: i32) -> (i32, i32) {
    %c0_i32 = arith.constant 0 : i32
    %c0_i32_0 = arith.constant 0 : i32
    %c0_i32_1 = arith.constant 0 : i32
    return %c0_i32, %c0_i32_0 : i32, i32
  }
  func.func @transform_4(%arg0: i32) -> (i32, i32) {
    %c0_i32 = arith.constant 0 : i32
    %c0_i32_0 = arith.constant 0 : i32
    %c0_i32_1 = arith.constant 0 : i32
    return %c0_i32, %c0_i32_0 : i32, i32
  }
  func.func @transform_5(%arg0: i32) -> (i32, i32) {
    %c0_i32 = arith.constant 0 : i32
    %c0_i32_0 = arith.constant 0 : i32
    %c0_i32_1 = arith.constant 0 : i32
    return %c0_i32, %c0_i32_0 : i32, i32
  }
  func.func @transform_6(%arg0: i32) -> (i32, i32, i32) {
    %c0_i32 = arith.constant 0 : i32
    %c0_i32_0 = arith.constant 0 : i32
    %c0_i32_1 = arith.constant 0 : i32
    return %arg0, %c0_i32, %c0_i32_0 : i32, i32, i32
  }
  func.func @transform_7(%arg0: i32) -> (i32, i32, i32) {
    %c0_i32 = arith.constant 0 : i32
    %c0_i32_0 = arith.constant 0 : i32
    %c0_i32_1 = arith.constant 0 : i32
    return %arg0, %c0_i32, %c0_i32_0 : i32, i32, i32
  }
  func.func @transform_8(%arg0: i32) -> (i32, i32, i32) {
    %c0_i32 = arith.constant 0 : i32
    %c0_i32_0 = arith.constant 0 : i32
    %c0_i32_1 = arith.constant 0 : i32
    return %arg0, %c0_i32, %c0_i32_0 : i32, i32, i32
  }
}

</mosaic_0001>

<bundles_post_ra>
// kernel: tpu_custom_call.1
= control target key start
LH: loop header
LB: loop body
LE: loop exit
PB: predicated region body
PF: predicated region fallthrough
CT: control target
= control target key end

     0   :  { %14 = vsyncpa [#allocation3], 0  ;;  %s442_s0 = inlined_call_operand.vmem [shape: bf16[2,16,16], index: 0, kind: input, shape index: {}]   ;;  %s443_s1 = inlined_call_operand.vmem [shape: f32[2,16,8], index: 1, kind: input, shape index: {}]   ;;  %s444_s2 = inlined_call_operand.vmem [shape: bf16[8,32], index: 2, kind: input, shape index: {}]   ;;  %s445_s3 = inlined_call_operand.vmem [shape: f32[1,32], index: 3, kind: input, shape index: {}]   ;;  %s446_s4 = inlined_call_operand.vmem [shape: f32[1,8], index: 4, kind: input, shape index: {}]   ;;  %s447_s5 = inlined_call_operand.vmem [shape: f32[1,8], index: 5, kind: input, shape index: {}]   ;;  %s448_s6 = inlined_call_operand.hbm [shape: f32[2,16,32], index: 6, kind: output, shape index: {0}]   ;;  %s449_s7 = inlined_call_operand.hbm [shape: f32[1,1,32], index: 7, kind: output, shape index: {1}]   ;;  %s450_s8 = inlined_call_operand.hbm [shape: f32[1,1,32], index: 8, kind: output, shape index: {2}]  }
   0x1   :  { %v31_v0 = vld [vmem:[%s443_s1] sm:$0xff]  ;;  %v32_v1 = vld [vmem:[%s443_s1 + $0x8] sm:$0xff]  ;;  %v33_v4 = vld [vmem:[%s443_s1 + $0x10] sm:$0xff] }
   0x2   :  { %v262_v2 = vld [vmem:[%s446_s4] ss:$0 sm:$0xff]  ;;  %v34_v5 = vld [vmem:[%s443_s1 + $0x18] sm:$0xff] }
   0x3   :  { %v263_v3 = vld [vmem:[%s447_s5] ss:$0 sm:$0xff]  ;;  %v38_v6 = vmul.f32 %v262_v2, %v31_v0  ;;  %v39_v7 = vmul.f32 %v262_v2, %v32_v1  ;;  %v40_v8 = vmul.f32 %v262_v2, %v33_v4  ;;  %v41_v9 = vmul.f32 %v262_v2, %v34_v5 }
   0x4   :  { %15 = vsyncpa [#allocation5], 0  ;;  %v254_v24 = vld [vmem:[%s442_s0] sm:$0xff]  ;;  %v255_v25 = vld [vmem:[%s442_s0 + $0x8] sm:$0xff]  ;;  %vm68_vm0 = vcmask 130048   ;;  %vm128_vm1 = vcmask 1043456  }
   0x5   :  { %v45_v10 = vadd.f32 %v263_v3, %v38_v6  ;;  %v46_v11 = vadd.f32 %v263_v3, %v39_v7  ;;  %v47_v12 = vadd.f32 %v263_v3, %v40_v8  ;;  %v48_v13 = vadd.f32 %v263_v3, %v41_v9  ;;  %v116_v26 = vld [vmem:[%s444_s2] sm:$0xf]  ;;  %s341_s2 = smov [#allocation2]   ;;  %s199_s24 = sshll.u32 %s448_s6, 4  ;;  %s200_s24 = int_to_ptr.hbm [resolvable:$true] %s199_s24 }
   0x6   :  { %v130_v27 = vsel %vm128_vm1, %v116_v26, 0  ;;  %vm121_vm2 = vcmask 64512   ;;  %v264_v34 = vld [vmem:[%s445_s3] ss:$0 sm:$0xff]  ;;  %vm155_vm3 = vcmask 261120   ;;  %s197_s21 = sshll.u32 %s341_s2, 4  ;;  %s198_s21 = int_to_ptr.vmem [resolvable:$true] %s197_s21 }
   0x7   :  { %v49_v14 = vpack.c.bf16 %v45_v10, %v45_v10  ;;  %v50_v15 = vpack.c.bf16 %v46_v11, %v46_v11  ;;  %v51_v16 = vpack.c.bf16 %v47_v12, %v47_v12  ;;  %v52_v17 = vpack.c.bf16 %v48_v13, %v48_v13  ;;  %139 = vmatpush.bf16.msra.mxu2 %v130_v27  ;;  %s342_s3 = smov 128   ;;  %s343_s6 = smov 8  }
   0x8   :  { %256 = vmatpush.bf16.msra.mxu3 %v130_v27  ;;  %s344_s25 = smov [#allocation4]   ;;  %s213_s29 = sshll.u32 %s449_s7, 4  ;;  %vm173_vm4 = vcmask 253952   ;;  %s214_s29 = int_to_ptr.hbm [resolvable:$true] %s213_s29 }
   0x9   :  { %v64_v18 = vunpack.c.l.b16 %v49_v14  ;;  %v65_v19 = vunpack.c.l.b16 %v50_v15  ;;  %v93_v20 = vunpack.c.l.b16 %v51_v16  ;;  %v94_v21 = vunpack.c.l.b16 %v52_v17  ;;  %s211_s26 = sshll.u32 %s344_s25, 4  ;;  %s345_s30 = smov [#allocation6]   ;;  %s212_s26 = int_to_ptr.vmem [resolvable:$true] %s211_s26 }
   0xa   :  { %s222_s9 = sshll.u32 %s345_s30, 4  ;;  %s224_s12 = sshll.u32 %s450_s8, 4  ;;  %s223_s9 = int_to_ptr.vmem [resolvable:$true] %s222_s9  ;;  %s225_s12 = int_to_ptr.hbm [resolvable:$true] %s224_s12 }
   0xb   :  { %v66_v22 = vpack.c.b16 %v65_v19, %v64_v18  ;;  %v95_v23 = vpack.c.b16 %v94_v21, %v93_v20 }
   0xd   :  { %79 = vmatpush.bf16.msra.mxu0 %v66_v22  ;;  %107 = vmatpush.bf16.msra.mxu1 %v95_v23 }
  0x10   :  { %246 = vmatmul.msk.bf16.vlgmr.msra.gmra.mxu0 %vm68_vm0, %v254_v24  ;;  %251 = vmatmul.msk.bf16.vlgmr.msra.gmra.mxu1 %vm68_vm0, %v255_v25 }
  0x8d   :  { %v81_v28 = vpop.f32.mrf.mxu0  ;;  %v109_v29 = vpop.f32.mrf.mxu1 }
  0x95   :  { %v83_v30 = vpop.f32.mrf.mxu0  ;;  %v111_v31 = vpop.f32.mrf.mxu1 }
  0x96   :  { %v114_v32 = vpack.c.bf16 %v83_v30, %v81_v28  ;;  %v115_v33 = vpack.c.bf16 %v111_v31, %v109_v29 }
  0x98   :  { %252 = vmatmul.msk.bf16.vlgmr.msra.gmra.mxu2 %vm121_vm2, %v114_v32  ;;  %253 = vmatmul.msk.bf16.vlgmr.msra.gmra.mxu3 %vm121_vm2, %v115_v33 }
 0x11b   :  { %v141_v35 = vpop.f32.mrf.mxu2  ;;  %v146_v36 = vpop.f32.mrf.mxu3 }
 0x11c   :  { %v142_v37 = vadd.f32 %v264_v34, %v141_v35  ;;  %v147_v38 = vadd.f32 %v264_v34, %v146_v36 }
 0x11e   :  { %v151_v39 = vmax.f32 %v142_v37, 0.0  ;;  %v153_v40 = vmax.f32 %v147_v38, 0.0 }
 0x120   :  { %156 = vst.msk [vmem:[#allocation2] sm:$0xff] %vm155_vm3, %v151_v39  ;;  %v175_v45 = vmul.f32 %v151_v39, %v151_v39  ;;  %v160_v48 = vsel %vm155_vm3, %v151_v39, 0.0  ;;  %v177_v49 = vmul.f32 %v153_v40, %v153_v40  ;;  %v163_v54 = vsel %vm155_vm3, %v153_v40, 0.0 }
 0x121   :  { %158 = vst.msk [vmem:[#allocation2 + $0x10] sm:$0xff] %vm155_vm3, %v153_v40 }
 0x122   :  { %v179_v53 = vsel %vm155_vm3, %v175_v45, 0.0  ;;  %v182_v59 = vsel %vm155_vm3, %v177_v49, 0.0 }
 0x123   :  { %v143_v41 = vpop.f32.mrf.mxu2  ;;  %v148_v42 = vpop.f32.mrf.mxu3 }
 0x124   :  { %v144_v43 = vadd.f32 %v264_v34, %v143_v41  ;;  %v149_v44 = vadd.f32 %v264_v34, %v148_v42 }
 0x126   :  { %v152_v46 = vmax.f32 %v144_v43, 0.0  ;;  %v154_v47 = vmax.f32 %v149_v44, 0.0 }
 0x128   :  { %157 = vst.msk [vmem:[#allocation2 + $0x8] sm:$0xff] %vm155_vm3, %v152_v46  ;;  %v161_v50 = vsel %vm155_vm3, %v152_v46, 0.0  ;;  %v176_v51 = vmul.f32 %v152_v46, %v152_v46  ;;  %v178_v56 = vmul.f32 %v154_v47, %v154_v47  ;;  %v165_v60 = vsel %vm155_vm3, %v154_v47, 0.0 }
 0x129   :  { %v162_v52 = vadd.f32 %v161_v50, %v160_v48  ;;  %159 = vst.msk [vmem:[#allocation2 + $0x18] sm:$0xff] %vm155_vm3, %v154_v47 }
 0x12a   :  { %v180_v55 = vsel %vm155_vm3, %v176_v51, 0.0  ;;  %205 = dma.vmem_to_hbm [thread:$0]  %s198_s21, 512, %s200_s24, [#allocation3], %s342_s3, %s342_s3, %s343_s6   ;;  %v184_v63 = vsel %vm155_vm3, %v178_v56, 0.0 }
 0x12b   :  { %v181_v57 = vadd.f32 %v180_v55, %v179_v53  ;;  %v164_v58 = vadd.f32 %v163_v54, %v162_v52 }
 0x12d   :  { %v166_v61 = vadd.f32 %v165_v60, %v164_v58  ;;  %v183_v62 = vadd.f32 %v182_v59, %v181_v57 }
 0x12f   :  { %v167_v0 = vrot.slane %v166_v61, 4  ;;  %v185_v1 = vadd.f32 %v184_v63, %v183_v62 }
 0x131   :  { %v168_v2 = vadd.f32 %v167_v0, %v166_v61  ;;  %v186_v3 = vrot.slane %v185_v1, 4 }
 0x133   :  { %v169_v4 = vrot.slane %v168_v2, 2  ;;  %v187_v5 = vadd.f32 %v186_v3, %v185_v1 }
 0x135   :  { %v170_v6 = vadd.f32 %v169_v4, %v168_v2  ;;  %v188_v7 = vrot.slane %v187_v5, 2 }
 0x137   :  { %v171_v8 = vrot.slane %v170_v6, 1  ;;  %v189_v9 = vadd.f32 %v188_v7, %v187_v5 }
 0x139   :  { %v172_v10 = vadd.f32 %v171_v8, %v170_v6  ;;  %v190_v11 = vrot.slane %v189_v9, 1 }
 0x13b   :  { %174 = vst.msk [vmem:[#allocation4] sm:$0x1] %vm173_vm4, %v172_v10  ;;  %v191_v12 = vadd.f32 %v190_v11, %v189_v9 }
 0x13c   :  { %216 = dma.vmem_to_hbm [thread:$0]  %s212_s26, 16, %s214_s29, [#allocation5]  }
 0x13d   :  { %192 = vst.msk [vmem:[#allocation6] sm:$0x1] %vm173_vm4, %v191_v12 }
 0x13e   :  { %227 = dma.vmem_to_hbm [thread:$0]  %s223_s9, 16, %s225_s12, [#allocation5]  }
 0x13f   :  { %337 = dma.done.wait [#allocation3], 512  }
 0x140   :  { %338 = vsyncadd [#allocation3], 4294966784 }
 0x141   :  { %339 = dma.done.wait [#allocation5], 32  }
 0x142   :  { %340 = vsyncadd [#allocation5], 4294967264 }
 0x143   :  { %240 = vsyncpa [#allocation3], 1 }
 0x144   :  { %241 = vsyncpa [#allocation5], 1 }

</bundles_post_ra>
